<compile_context>
chip_gen: v7x
topology: tpu7x:2x2x1
jax: 0.10.0
libtpu: 0.0.40
codegen_flags: <defaults>
</compile_context>

<pallas_src>
import functools

import jax
import jax.numpy as jnp
from jax.experimental import pallas as pl
from jax.experimental.pallas import tpu as pltpu

HIDDEN = 32            # hidden_size of the module
OUT_DIM = 300          # latent output dim (N x 300 per the docstring)
OUT_PAD = 384          # 300 padded up to 3 * 128 lanes (lane-dense stores)
CONV_F = 8             # backbone feature channels (simplified Mask-RCNN backbone)
ROI_P = 4              # ROI crop size (simplified ROIAlign)
ROI_POS = ROI_P * ROI_P            # 16 spatial positions per box
FEAT_FLAT = ROI_POS * CONV_F       # 128 = per-box flattened feature dim
KDIM = 27              # 3*3*3 im2col contraction
KDIM_PAD = 32          # padded to a sublane-friendly size
TEXT_DIM = 512         # Universal Sentence Encoder embedding dim (use=True)
NUM_BOXES = 4          # boxes per image


# ---------------------------------------------------------------------------
# Fused Pallas kernel: conv matmul + per-box MLP + text MLP, all in VMEM
# ---------------------------------------------------------------------------
def _full_spec(shape):
    """BlockSpec covering the full array (block == array dims, grid=(1,))."""
    nd = len(shape)
    return pl.BlockSpec(shape, lambda i, _n=nd: (0,) * _n)


def _fused_forward_kernel(ext_ref, txt_ref,
                          wblk_ref, cb_ref,
                          iw1_ref, ib1_ref, iw2_ref, ib2_ref,
                          tw1_ref, tb1_ref, tw2_ref, tb2_ref,
                          zimg_ref, ztxt_ref):
    # --- backbone conv as block-diagonal matmul on the gathered ROI patch rows.
    # ext: (K*N, 16*32) bf16, wblk: (512, 128) bf16 (block-diag of the 32x8 conv
    # weight) -> box_feats lands directly in (K*N, 128) layout, lane-dense.
    bf = jnp.dot(ext_ref[...], wblk_ref[...], preferred_element_type=jnp.float32)
    bf = jnp.maximum(bf + cb_ref[...], 0.0)                       # (K*N, 128) f32

    # --- ProcessMaskRCNNFeats MLP: 128 -> hidden -> 384 (padded 300) ---
    h = jnp.dot(bf.astype(jnp.bfloat16), iw1_ref[...],
                preferred_element_type=jnp.float32)
    h = jnp.maximum(h + ib1_ref[...], 0.0)                        # (K*N, HIDDEN)
    z = jnp.dot(h.astype(jnp.bfloat16), iw2_ref[...],
                preferred_element_type=jnp.float32)
    zimg_ref[...] = z + ib2_ref[...]                              # (K*N, 384)

    # --- ToyText MLP on [match; diff] stacked rows: 512 -> hidden -> 384 ---
    ht = jnp.dot(txt_ref[...], tw1_ref[...],
                 preferred_element_type=jnp.float32)
    ht = jnp.maximum(ht + tb1_ref[...], 0.0)                      # (2N, HIDDEN)
    zt = jnp.dot(ht.astype(jnp.bfloat16), tw2_ref[...],
                 preferred_element_type=jnp.float32)
    ztxt_ref[...] = zt + tb2_ref[...]                             # (2N, 384)


def fused_forward(ext, texts, params):
    nk = ext.shape[0]
    nt = texts.shape[0]
    args = (ext, texts,
            params["conv_w_blk"], params["conv_b_tiled"],
            params["img_w1"], params["img_b1"], params["img_w2p"], params["img_b2p"],
            params["txt_w1"], params["txt_b1"], params["txt_w2p"], params["txt_b2p"])
    return pl.pallas_call(
        _fused_forward_kernel,
        grid=(1,),
        in_specs=[_full_spec(a.shape) for a in args],
        out_specs=(_full_spec((nk, OUT_PAD)), _full_spec((nt, OUT_PAD))),
        out_shape=(jax.ShapeDtypeStruct((nk, OUT_PAD), jnp.float32),
                   jax.ShapeDtypeStruct((nt, OUT_PAD), jnp.float32)),
        # Single grid step: everything fits VMEM on v5e/v6e/v7x. When batch/boxes
        # scale up, add a "parallel" row-tiled grid axis here to use both v7x TCs.
        compiler_params=pltpu.CompilerParams(dimension_semantics=("arbitrary",)),
    )(*args)


# ---------------------------------------------------------------------------
# Deterministic parameter initialization (shapes implied by the module)
# ---------------------------------------------------------------------------
def init_params(key):
    ks = jax.random.split(key, 6)

    def w(k, shape, fan_in):
        return jax.random.normal(k, shape, jnp.float32) / jnp.sqrt(jnp.float32(fan_in))

    # simplified Mask-RCNN backbone: single 3x3 conv, 3 -> CONV_F channels
    conv_w = jnp.pad(w(ks[0], (KDIM, CONV_F), KDIM),
                     ((0, KDIM_PAD - KDIM), (0, 0)))               # (32, 8)
    conv_b = jnp.zeros((1, CONV_F), jnp.float32)
    # block-diagonal expansion: one conv matmul emits the (K*N, 128) per-box
    # feature slab directly (16 diagonal copies of the 32x8 conv weight).
    conv_w_blk = jnp.kron(jnp.eye(ROI_POS, dtype=jnp.float32), conv_w)  # (512, 128)

    img_w2 = w(ks[2], (HIDDEN, OUT_DIM), HIDDEN)
    txt_w2 = w(ks[4], (HIDDEN, OUT_DIM), HIDDEN)

    return {
        "conv_w_blk": conv_w_blk.astype(jnp.bfloat16),             # (512, 128)
        "conv_b_tiled": jnp.tile(conv_b, (1, ROI_POS)),            # (1, 128) f32
        # ProcessMaskRCNNFeats: flatten(128) -> hidden -> 300 (padded 384)
        "img_w1": w(ks[1], (FEAT_FLAT, HIDDEN), FEAT_FLAT).astype(jnp.bfloat16),
        "img_b1": jnp.zeros((1, HIDDEN), jnp.float32),
        "img_w2p": jnp.pad(img_w2, ((0, 0), (0, OUT_PAD - OUT_DIM))).astype(jnp.bfloat16),
        "img_b2p": jnp.zeros((1, OUT_PAD), jnp.float32),
        # ToyText (USE path): 512 -> hidden -> 300 (padded 384)
        "txt_w1": w(ks[3], (TEXT_DIM, HIDDEN), TEXT_DIM).astype(jnp.bfloat16),
        "txt_b1": jnp.zeros((1, HIDDEN), jnp.float32),
        "txt_w2p": jnp.pad(txt_w2, ((0, 0), (0, OUT_PAD - OUT_DIM))).astype(jnp.bfloat16),
        "txt_b2p": jnp.zeros((1, OUT_PAD), jnp.float32),
    }


# ---------------------------------------------------------------------------
# Forward pass (mirrors CombinedModelMaskRCNN.forward with use=True)
# ---------------------------------------------------------------------------
@functools.partial(jax.jit, static_argnums=(3, 4, 5))
def combined_forward(img, text_match, text_diff, batch_size, seq_len_match,
                     seq_len_diff, bboxes, bbox_classes, params):
    N, C, H, W = img.shape
    K = bboxes.shape[1]

    # --- im2col for the 3x3 / pad=1 conv (XLA-fused; ~64 KB intermediate) ---
    x = jnp.transpose(img, (0, 2, 3, 1))                       # NCHW -> NHWC
    xp = jnp.pad(x, ((0, 0), (1, 1), (1, 1), (0, 0)))
    cols = [xp[:, dy:dy + H, dx:dx + W, :] for dy in range(3) for dx in range(3)]
    patches = jnp.concatenate(cols, axis=-1).reshape(N * H * W, C * 9)
    patches = jnp.pad(patches, ((0, 0), (0, KDIM_PAD - C * 9)))  # 27 -> 32
    patches = patches.astype(jnp.bfloat16)

    # --- simplified ROI pooling: fixed PxP crop at each bbox top-left (clamped).
    # The conv is pointwise over im2col rows, so gathering the ROI rows before
    # the conv matmul is exact and skips all non-ROI positions.
    x0 = jnp.clip(bboxes[..., 0].astype(jnp.int32), 0, W - ROI_P)   # (N, K)
    y0 = jnp.clip(bboxes[..., 1].astype(jnp.int32), 0, H - ROI_P)
    base = jnp.arange(N, dtype=jnp.int32)[:, None] * (H * W) + y0 * W + x0
    offs = (jnp.arange(ROI_P, dtype=jnp.int32)[:, None] * W
            + jnp.arange(ROI_P, dtype=jnp.int32)[None, :]).reshape(-1)   # (16,)
    idx = base[..., None] + offs[None, None, :]                  # (N, K, 16)
    # k-major row order so the kernel output is already (K, N, ...) like
    # torch.stack([img_model(img[:, i]) for i in range(num_boxes)]).
    idx = jnp.transpose(idx, (1, 0, 2)).reshape(-1)              # (K*N*16,)
    ext = patches[idx].reshape(K * N, ROI_POS * KDIM_PAD)        # (K*N, 512) bf16

    # --- both captions share the text MLP: run them as one batch ---
    texts = jnp.concatenate([text_match, text_diff], axis=0).astype(jnp.bfloat16)

    z_img_pad, z_txt_pad = fused_forward(ext, texts, params)

    z_img = z_img_pad[:, :OUT_DIM].reshape(K, N, OUT_DIM)
    z_text_match = z_txt_pad[:N, :OUT_DIM]
    z_text_diff = z_txt_pad[N:2 * N, :OUT_DIM]
    return z_img, z_text_match, z_text_diff


if __name__ == "__main__":
    key = jax.random.PRNGKey(0)
    kimg, ktm, ktd, kbx, kp = jax.random.split(key, 5)

    N = 2
    img = jax.random.normal(kimg, (N, 3, 16, 16), jnp.float32)          # NCHW, like PyTorch
    text_match = jax.random.normal(ktm, (N, TEXT_DIM), jnp.float32)     # USE embeddings
    text_diff = jax.random.normal(ktd, (N, TEXT_DIM), jnp.float32)
    bboxes = jax.random.randint(kbx, (N, NUM_BOXES, 4), 0, 12, jnp.int32)
    bbox_classes = jnp.zeros((N, NUM_BOXES), jnp.int32)                 # dummy (unused)

    params = init_params(kp)

    z_img, z_tm, z_td = combined_forward(
        img, text_match, text_diff, N, None, None, bboxes, bbox_classes, params)
    jax.block_until_ready((z_img, z_tm, z_td))

    assert z_img.shape == (NUM_BOXES, N, OUT_DIM)
    assert z_tm.shape == (N, OUT_DIM)
    assert z_td.shape == (N, OUT_DIM)
    print("KERNEL_OK")
</pallas_src>

<mosaic_0001>
module attributes {stable_mosaic.version = 11 : i64} {
  func.func @_fused_forward_kernel(%arg0: i32, %arg1: memref<8x512xbf16, #tpu.memory_space<vmem>>, %arg2: memref<4x512xbf16, #tpu.memory_space<vmem>>, %arg3: memref<512x128xbf16, #tpu.memory_space<vmem>>, %arg4: memref<1x128xf32, #tpu.memory_space<vmem>>, %arg5: memref<128x32xbf16, #tpu.memory_space<vmem>>, %arg6: memref<1x32xf32, #tpu.memory_space<vmem>>, %arg7: memref<32x384xbf16, #tpu.memory_space<vmem>>, %arg8: memref<1x384xf32, #tpu.memory_space<vmem>>, %arg9: memref<512x32xbf16, #tpu.memory_space<vmem>>, %arg10: memref<1x32xf32, #tpu.memory_space<vmem>>, %arg11: memref<32x384xbf16, #tpu.memory_space<vmem>>, %arg12: memref<1x384xf32, #tpu.memory_space<vmem>>, %arg13: memref<8x384xf32, #tpu.memory_space<vmem>>, %arg14: memref<4x384xf32, #tpu.memory_space<vmem>>) attributes {dimension_semantics = [#tpu.dimension_semantics<arbitrary>], iteration_bounds = array<i64: 1>, scalar_prefetch = 0 : i64, scratch_operands = 0 : i64, tpu.core_type = #tpu.core_type<tc>, window_params = [{pipeline_mode = #tpu.pipeline_mode<synchronous>, transform_indices = @transform_0, window_bounds = array<i64: 8, 512>}, {pipeline_mode = #tpu.pipeline_mode<synchronous>, transform_indices = @transform_1, window_bounds = array<i64: 4, 512>}, {pipeline_mode = #tpu.pipeline_mode<synchronous>, transform_indices = @transform_2, window_bounds = array<i64: 512, 128>}, {pipeline_mode = #tpu.pipeline_mode<synchronous>, transform_indices = @transform_3, window_bounds = array<i64: 1, 128>}, {pipeline_mode = #tpu.pipeline_mode<synchronous>, transform_indices = @transform_4, window_bounds = array<i64: 128, 32>}, {pipeline_mode = #tpu.pipeline_mode<synchronous>, transform_indices = @transform_5, window_bounds = array<i64: 1, 32>}, {pipeline_mode = #tpu.pipeline_mode<synchronous>, transform_indices = @transform_6, window_bounds = array<i64: 32, 384>}, {pipeline_mode = #tpu.pipeline_mode<synchronous>, transform_indices = @transform_7, window_bounds = array<i64: 1, 384>}, {pipeline_mode = #tpu.pipeline_mode<synchronous>, transform_indices = @transform_8, window_bounds = array<i64: 512, 32>}, {pipeline_mode = #tpu.pipeline_mode<synchronous>, transform_indices = @transform_9, window_bounds = array<i64: 1, 32>}, {pipeline_mode = #tpu.pipeline_mode<synchronous>, transform_indices = @transform_10, window_bounds = array<i64: 32, 384>}, {pipeline_mode = #tpu.pipeline_mode<synchronous>, transform_indices = @transform_11, window_bounds = array<i64: 1, 384>}, {pipeline_mode = #tpu.pipeline_mode<synchronous>, transform_indices = @transform_12, window_bounds = array<i64: 8, 384>}, {pipeline_mode = #tpu.pipeline_mode<synchronous>, transform_indices = @transform_13, window_bounds = array<i64: 4, 384>}]} {
    %c0 = arith.constant 0 : index
    %c0_0 = arith.constant 0 : index
    %0 = vector.load %arg1[%c0, %c0_0] : memref<8x512xbf16, #tpu.memory_space<vmem>>, vector<8x512xbf16>
    %c0_1 = arith.constant 0 : index
    %c0_2 = arith.constant 0 : index
    %1 = vector.load %arg3[%c0_1, %c0_2] : memref<512x128xbf16, #tpu.memory_space<vmem>>, vector<512x128xbf16>
    %cst = arith.constant dense<0.000000e+00> : vector<8x128xf32>
    %2 = tpu.matmul %0, %1, %cst {dimension_numbers = #tpu.dot_dimension_numbers<[1], [0], [0], [1], [0, 0, 1, 1], [], []>} : vector<8x512xbf16>, vector<512x128xbf16>, vector<8x128xf32> -> vector<8x128xf32>
    %c0_3 = arith.constant 0 : index
    %c0_4 = arith.constant 0 : index
    %3 = vector.load %arg4[%c0_3, %c0_4] : memref<1x128xf32, #tpu.memory_space<vmem>>, vector<1x128xf32>
    %4 = vector.broadcast %3 : vector<1x128xf32> to vector<8x128xf32>
    %5 = arith.addf %2, %4 : vector<8x128xf32>
    %cst_5 = arith.constant 0.000000e+00 : f32
    %6 = vector.broadcast %cst_5 : f32 to vector<8x128xf32>
    %7 = arith.maximumf %5, %6 : vector<8x128xf32>
    %8 = arith.truncf %7 : vector<8x128xf32> to vector<8x128xbf16>
    %c0_6 = arith.constant 0 : index
    %c0_7 = arith.constant 0 : index
    %9 = vector.load %arg5[%c0_6, %c0_7] : memref<128x32xbf16, #tpu.memory_space<vmem>>, vector<128x32xbf16>
    %cst_8 = arith.constant dense<0.000000e+00> : vector<8x32xf32>
    %10 = tpu.matmul %8, %9, %cst_8 {dimension_numbers = #tpu.dot_dimension_numbers<[1], [0], [0], [1], [0, 0, 1, 1], [], []>} : vector<8x128xbf16>, vector<128x32xbf16>, vector<8x32xf32> -> vector<8x32xf32>
    %c0_9 = arith.constant 0 : index
    %c0_10 = arith.constant 0 : index
    %11 = vector.load %arg6[%c0_9, %c0_10] : memref<1x32xf32, #tpu.memory_space<vmem>>, vector<1x32xf32>
    %12 = vector.broadcast %11 : vector<1x32xf32> to vector<8x32xf32>
    %13 = arith.addf %10, %12 : vector<8x32xf32>
    %cst_11 = arith.constant 0.000000e+00 : f32
    %14 = vector.broadcast %cst_11 : f32 to vector<8x32xf32>
    %15 = arith.maximumf %13, %14 : vector<8x32xf32>
    %16 = arith.truncf %15 : vector<8x32xf32> to vector<8x32xbf16>
    %c0_12 = arith.constant 0 : index
    %c0_13 = arith.constant 0 : index
    %17 = vector.load %arg7[%c0_12, %c0_13] : memref<32x384xbf16, #tpu.memory_space<vmem>>, vector<32x384xbf16>
    %cst_14 = arith.constant dense<0.000000e+00> : vector<8x384xf32>
    %18 = tpu.matmul %16, %17, %cst_14 {dimension_numbers = #tpu.dot_dimension_numbers<[1], [0], [0], [1], [0, 0, 1, 1], [], []>} : vector<8x32xbf16>, vector<32x384xbf16>, vector<8x384xf32> -> vector<8x384xf32>
    %c0_15 = arith.constant 0 : index
    %c0_16 = arith.constant 0 : index
    %19 = vector.load %arg8[%c0_15, %c0_16] : memref<1x384xf32, #tpu.memory_space<vmem>>, vector<1x384xf32>
    %20 = vector.broadcast %19 : vector<1x384xf32> to vector<8x384xf32>
    %21 = arith.addf %18, %20 : vector<8x384xf32>
    %c0_17 = arith.constant 0 : index
    %c0_18 = arith.constant 0 : index
    %22 = vector.load %arg13[%c0_17, %c0_18] : memref<8x384xf32, #tpu.memory_space<vmem>>, vector<8x384xf32>
    tpu.vector_store %arg13[%c0_17, %c0_18], %21 {strides = array<i32>} : memref<8x384xf32, #tpu.memory_space<vmem>>, vector<8x384xf32>,
    %c0_19 = arith.constant 0 : index
    %c0_20 = arith.constant 0 : index
    %23 = vector.load %arg2[%c0_19, %c0_20] : memref<4x512xbf16, #tpu.memory_space<vmem>>, vector<4x512xbf16>
    %c0_21 = arith.constant 0 : index
    %c0_22 = arith.constant 0 : index
    %24 = vector.load %arg9[%c0_21, %c0_22] : memref<512x32xbf16, #tpu.memory_space<vmem>>, vector<512x32xbf16>
    %cst_23 = arith.constant dense<0.000000e+00> : vector<4x32xf32>
    %25 = tpu.matmul %23, %24, %cst_23 {dimension_numbers = #tpu.dot_dimension_numbers<[1], [0], [0], [1], [0, 0, 1, 1], [], []>} : vector<4x512xbf16>, vector<512x32xbf16>, vector<4x32xf32> -> vector<4x32xf32>
    %c0_24 = arith.constant 0 : index
    %c0_25 = arith.constant 0 : index
    %26 = vector.load %arg10[%c0_24, %c0_25] : memref<1x32xf32, #tpu.memory_space<vmem>>, vector<1x32xf32>
    %27 = vector.broadcast %26 : vector<1x32xf32> to vector<4x32xf32>
    %28 = arith.addf %25, %27 : vector<4x32xf32>
    %cst_26 = arith.constant 0.000000e+00 : f32
    %29 = vector.broadcast %cst_26 : f32 to vector<4x32xf32>
    %30 = arith.maximumf %28, %29 : vector<4x32xf32>
    %31 = arith.truncf %30 : vector<4x32xf32> to vector<4x32xbf16>
    %c0_27 = arith.constant 0 : index
    %c0_28 = arith.constant 0 : index
    %32 = vector.load %arg11[%c0_27, %c0_28] : memref<32x384xbf16, #tpu.memory_space<vmem>>, vector<32x384xbf16>
    %cst_29 = arith.constant dense<0.000000e+00> : vector<4x384xf32>
    %33 = tpu.matmul %31, %32, %cst_29 {dimension_numbers = #tpu.dot_dimension_numbers<[1], [0], [0], [1], [0, 0, 1, 1], [], []>} : vector<4x32xbf16>, vector<32x384xbf16>, vector<4x384xf32> -> vector<4x384xf32>
    %c0_30 = arith.constant 0 : index
    %c0_31 = arith.constant 0 : index
    %34 = vector.load %arg12[%c0_30, %c0_31] : memref<1x384xf32, #tpu.memory_space<vmem>>, vector<1x384xf32>
    %35 = vector.broadcast %34 : vector<1x384xf32> to vector<4x384xf32>
    %36 = arith.addf %33, %35 : vector<4x384xf32>
    %c0_32 = arith.constant 0 : index
    %c0_33 = arith.constant 0 : index
    %37 = vector.load %arg14[%c0_32, %c0_33] : memref<4x384xf32, #tpu.memory_space<vmem>>, vector<4x384xf32>
    tpu.vector_store %arg14[%c0_32, %c0_33], %36 {strides = array<i32>} : memref<4x384xf32, #tpu.memory_space<vmem>>, vector<4x384xf32>,
    return
  }
  func.func @transform_0(%arg0: i32) -> (i32, i32) {
    %c0_i32 = arith.constant 0 : i32
    %c0_i32_0 = arith.constant 0 : i32
    %c0_i32_1 = arith.constant 0 : i32
    return %c0_i32, %c0_i32_0 : i32, i32
  }
  func.func @transform_1(%arg0: i32) -> (i32, i32) {
    %c0_i32 = arith.constant 0 : i32
    %c0_i32_0 = arith.constant 0 : i32
    %c0_i32_1 = arith.constant 0 : i32
    return %c0_i32, %c0_i32_0 : i32, i32
  }
  func.func @transform_2(%arg0: i32) -> (i32, i32) {
    %c0_i32 = arith.constant 0 : i32
    %c0_i32_0 = arith.constant 0 : i32
    %c0_i32_1 = arith.constant 0 : i32
    return %c0_i32, %c0_i32_0 : i32, i32
  }
  func.func @transform_3(%arg0: i32) -> (i32, i32) {
    %c0_i32 = arith.constant 0 : i32
    %c0_i32_0 = arith.constant 0 : i32
    %c0_i32_1 = arith.constant 0 : i32
    return %c0_i32, %c0_i32_0 : i32, i32
  }
  func.func @transform_4(%arg0: i32) -> (i32, i32) {
    %c0_i32 = arith.constant 0 : i32
    %c0_i32_0 = arith.constant 0 : i32
    %c0_i32_1 = arith.constant 0 : i32
    return %c0_i32, %c0_i32_0 : i32, i32
  }
  func.func @transform_5(%arg0: i32) -> (i32, i32) {
    %c0_i32 = arith.constant 0 : i32
    %c0_i32_0 = arith.constant 0 : i32
    %c0_i32_1 = arith.constant 0 : i32
    return %c0_i32, %c0_i32_0 : i32, i32
  }
  func.func @transform_6(%arg0: i32) -> (i32, i32) {
    %c0_i32 = arith.constant 0 : i32
    %c0_i32_0 = arith.constant 0 : i32
    %c0_i32_1 = arith.constant 0 : i32
    return %c0_i32, %c0_i32_0 : i32, i32
  }
  func.func @transform_7(%arg0: i32) -> (i32, i32) {
    %c0_i32 = arith.constant 0 : i32
    %c0_i32_0 = arith.constant 0 : i32
    %c0_i32_1 = arith.constant 0 : i32
    return %c0_i32, %c0_i32_0 : i32, i32
  }
  func.func @transform_8(%arg0: i32) -> (i32, i32) {
    %c0_i32 = arith.constant 0 : i32
    %c0_i32_0 = arith.constant 0 : i32
    %c0_i32_1 = arith.constant 0 : i32
    return %c0_i32, %c0_i32_0 : i32, i32
  }
  func.func @transform_9(%arg0: i32) -> (i32, i32) {
    %c0_i32 = arith.constant 0 : i32
    %c0_i32_0 = arith.constant 0 : i32
    %c0_i32_1 = arith.constant 0 : i32
    return %c0_i32, %c0_i32_0 : i32, i32
  }
  func.func @transform_10(%arg0: i32) -> (i32, i32) {
    %c0_i32 = arith.constant 0 : i32
    %c0_i32_0 = arith.constant 0 : i32
    %c0_i32_1 = arith.constant 0 : i32
    return %c0_i32, %c0_i32_0 : i32, i32
  }
  func.func @transform_11(%arg0: i32) -> (i32, i32) {
    %c0_i32 = arith.constant 0 : i32
    %c0_i32_0 = arith.constant 0 : i32
    %c0_i32_1 = arith.constant 0 : i32
    return %c0_i32, %c0_i32_0 : i32, i32
  }
  func.func @transform_12(%arg0: i32) -> (i32, i32) {
    %c0_i32 = arith.constant 0 : i32
    %c0_i32_0 = arith.constant 0 : i32
    %c0_i32_1 = arith.constant 0 : i32
    return %c0_i32, %c0_i32_0 : i32, i32
  }
  func.func @transform_13(%arg0: i32) -> (i32, i32) {
    %c0_i32 = arith.constant 0 : i32
    %c0_i32_0 = arith.constant 0 : i32
    %c0_i32_1 = arith.constant 0 : i32
    return %c0_i32, %c0_i32_0 : i32, i32
  }
}

</mosaic_0001>

<bundles_post_ra>
// kernel: combined_forward.1
= control target key start
LH: loop header
LB: loop body
LE: loop exit
PB: predicated region body
PF: predicated region fallthrough
CT: control target
= control target key end

     0   :  { %v1517_v39 = vmov 0.0   ;;  %vm1518_vm0 = vmmov 0   ;;  %vm575_vm1 = vcmask 261120   ;;  %s1912_s2 = inlined_call_operand.vmem [shape: bf16[512,128], index: 2, kind: input, shape index: {}]   ;;  %s1913_s0 = inlined_call_operand.vmem [shape: bf16[8,512], index: 0, kind: input, shape index: {}]   ;;  %s1914_s4 = inlined_call_operand.vmem [shape: bf16[128,32], index: 4, kind: input, shape index: {}]   ;;  %s1915_s6 = inlined_call_operand.vmem [shape: bf16[32,384], index: 6, kind: input, shape index: {}]   ;;  %s1916_s3 = inlined_call_operand.vmem [shape: f32[1,128], index: 3, kind: input, shape index: {}]   ;;  %s1917_s8 = inlined_call_operand.vmem [shape: bf16[512,32], index: 8, kind: input, shape index: {}]   ;;  %s1918_s1 = inlined_call_operand.vmem [shape: bf16[4,512], index: 1, kind: input, shape index: {}]   ;;  %s1919_s5 = inlined_call_operand.vmem [shape: f32[1,32], index: 5, kind: input, shape index: {}]   ;;  %s1920_s10 = inlined_call_operand.vmem [shape: bf16[32,384], index: 10, kind: input, shape index: {}]   ;;  %s1921_s7 = inlined_call_operand.vmem [shape: f32[1,384], index: 7, kind: input, shape index: {}]   ;;  %s1922_s12 = inlined_call_operand.vmem [shape: f32[8,384], index: 12, kind: output, shape index: {0}]   ;;  %s1923_s9 = inlined_call_operand.vmem [shape: f32[1,32], index: 9, kind: input, shape index: {}]   ;;  %s1924_s11 = inlined_call_operand.vmem [shape: f32[1,384], index: 11, kind: input, shape index: {}]   ;;  %s1925_s13 = inlined_call_operand.vmem [shape: f32[4,384], index: 13, kind: output, shape index: {1}]  }
   0x1   :  { %v1424_v0 = vld [vmem:[%s1912_s2 + $0x40] sm:$0xff]   ;;  %v1428_v4 = vld [vmem:[%s1912_s2 + $0x48] sm:$0xff]   ;;  %v1432_v8 = vld [vmem:[%s1912_s2 + $0x50] sm:$0xff]  }
   0x2   :  { %v1425_v1 = vld [vmem:[%s1912_s2 + $0xc0] sm:$0xff]   ;;  %1281 = vmatprep.subr.bf16.mxu0 %v1424_v0  ;;  %v1429_v5 = vld [vmem:[%s1912_s2 + $0xc8] sm:$0xff]   ;;  %v1433_v9 = vld [vmem:[%s1912_s2 + $0xd0] sm:$0xff]  }
   0x3   :  { %v1426_v2 = vld [vmem:[%s1912_s2] sm:$0xff]   ;;  %1303 = vmatprep.subr.bf16.mxu1 %v1425_v1  ;;  %v1430_v6 = vld [vmem:[%s1912_s2 + $0x8] sm:$0xff]   ;;  %v1434_v10 = vld [vmem:[%s1912_s2 + $0x10] sm:$0xff]  }
   0x4   :  { %v1427_v3 = vld [vmem:[%s1912_s2 + $0x80] sm:$0xff]   ;;  %1282 = vmatpush3.bf16.msra.mxu0 %v1426_v2  ;;  %v1431_v7 = vld [vmem:[%s1912_s2 + $0x88] sm:$0xff]   ;;  %v1435_v11 = vld [vmem:[%s1912_s2 + $0x90] sm:$0xff]   ;;  %v1519_v2 = vmov 0  }
   0x5   :  { %1304 = vmatpush3.bf16.msra.mxu1 %v1427_v3  ;;  %1283 = vmatprep.subr.bf16.mxu0 %v1428_v4  ;;  %v1436_v12 = vld [vmem:[%s1912_s2 + $0x58] sm:$0xff]   ;;  %v1440_v16 = vld [vmem:[%s1912_s2 + $0x60] sm:$0xff]   ;;  %v1444_v20 = vld [vmem:[%s1912_s2 + $0x68] sm:$0xff]  }
   0x6   :  { %1305 = vmatprep.subr.bf16.mxu1 %v1429_v5  ;;  %v1437_v13 = vld [vmem:[%s1912_s2 + $0xd8] sm:$0xff]   ;;  %v1441_v17 = vld [vmem:[%s1912_s2 + $0xe0] sm:$0xff]   ;;  %v1445_v21 = vld [vmem:[%s1912_s2 + $0xe8] sm:$0xff]  }
   0x7   :  { %v1438_v14 = vld [vmem:[%s1912_s2 + $0x18] sm:$0xff]   ;;  %v1442_v18 = vld [vmem:[%s1912_s2 + $0x20] sm:$0xff]   ;;  %v1446_v22 = vld [vmem:[%s1912_s2 + $0x28] sm:$0xff]  }
   0x8   :  { %1284 = vmatpush3.bf16.msra.mxu0 %v1430_v6  ;;  %v1439_v15 = vld [vmem:[%s1912_s2 + $0x98] sm:$0xff]   ;;  %v1443_v19 = vld [vmem:[%s1912_s2 + $0xa0] sm:$0xff]   ;;  %v1447_v23 = vld [vmem:[%s1912_s2 + $0xa8] sm:$0xff]  }
   0x9   :  { %1306 = vmatpush3.bf16.msra.mxu1 %v1431_v7  ;;  %1285 = vmatprep.subr.bf16.mxu0 %v1432_v8  ;;  %v1448_v24 = vld [vmem:[%s1912_s2 + $0x70] sm:$0xff]   ;;  %v1452_v28 = vld [vmem:[%s1912_s2 + $0x78] sm:$0xff]   ;;  %v44_v32 = vld [vmem:[%s1913_s0] sm:$0xff] }
   0xa   :  { %1307 = vmatprep.subr.bf16.mxu1 %v1433_v9  ;;  %v1449_v25 = vld [vmem:[%s1912_s2 + $0xf0] sm:$0xff]   ;;  %v1453_v29 = vld [vmem:[%s1912_s2 + $0xf8] sm:$0xff]   ;;  %v45_v33 = vld [vmem:[%s1913_s0 + $0x8] sm:$0xff]  ;;  %v1187_v34 = vcombine.low %v44_v32, %v44_v32  ;;  %v1188_v35 = vcombine.high %v44_v32, %v44_v32 }
   0xb   :  { %v1450_v26 = vld [vmem:[%s1912_s2 + $0x30] sm:$0xff]   ;;  %v1454_v30 = vld [vmem:[%s1912_s2 + $0x38] sm:$0xff]   ;;  %v1189_v36 = vcombine.low %v45_v33, %v45_v33  ;;  %v1190_v37 = vcombine.high %v45_v33, %v45_v33  ;;  %v1460_v38 = vld [vmem:[%s1914_s4] sm:$0xff]  }
   0xc   :  { %1286 = vmatpush3.bf16.msra.mxu0 %v1434_v10  ;;  %v1451_v27 = vld [vmem:[%s1912_s2 + $0xb0] sm:$0xff]   ;;  %v1455_v31 = vld [vmem:[%s1912_s2 + $0xb8] sm:$0xff]   ;;  %355 = vmatprep.mubr.bf16.mxu0 %v1188_v35  ;;  %v1461_v40 = vld [vmem:[%s1914_s4 + $0x8] sm:$0xff]  }
   0xd   :  { %1308 = vmatpush3.bf16.msra.mxu1 %v1435_v11  ;;  %1287 = vmatprep.subr.bf16.mxu0 %v1436_v12  ;;  %v1462_v41 = vld [vmem:[%s1914_s4 + $0x10] sm:$0xff]   ;;  %v1463_v42 = vld [vmem:[%s1914_s4 + $0x18] sm:$0xff]   ;;  %v1464_v43 = vld [vmem:[%s1914_s4 + $0x20] sm:$0xff]  }
   0xe   :  { %1309 = vmatprep.subr.bf16.mxu1 %v1437_v13  ;;  %395 = vmatprep.mubr.bf16.mxu1 %v1190_v37  ;;  %v1465_v44 = vld [vmem:[%s1914_s4 + $0x28] sm:$0xff]   ;;  %v1466_v45 = vld [vmem:[%s1914_s4 + $0x30] sm:$0xff]   ;;  %v1467_v46 = vld [vmem:[%s1914_s4 + $0x38] sm:$0xff]  }
   0xf   :  { %v1468_v47 = vld [vmem:[%s1915_s6] ss:$12 sps:$4 sm:$0xff]   ;;  %v1470_v48 = vld [vmem:[%s1915_s6 + $0x4] ss:$12 sps:$4 sm:$0xff]   ;;  %v1473_v0 = vld [vmem:[%s1915_s6 + $0x1c] ss:$12 sps:$4 sm:$0xff]  }
  0x10   :  { %1288 = vmatpush3.bf16.msra.mxu0 %v1438_v14  ;;  %v1186_v51 = vld [vmem:[%s1916_s3] ss:$0 sm:$0xff]  ;;  %v1471_v1 = vld [vmem:[%s1915_s6 + $0x18] ss:$12 sps:$4 sm:$0xff]   ;;  %v1480_v5 = vld [vmem:[%s1917_s8 + $0xc8] sm:$0xff]  }
  0x11   :  { %1310 = vmatpush3.bf16.msra.mxu1 %v1439_v15  ;;  %1289 = vmatprep.subr.bf16.mxu0 %v1440_v16  ;;  %v1476_v3 = vld [vmem:[%s1917_s8 + $0xc0] sm:$0xff]   ;;  %v1482_v6 = vld [vmem:[%s1917_s8 + $0x88] sm:$0xff]   ;;  %v1484_v7 = vld [vmem:[%s1917_s8 + $0xd0] sm:$0xff]  }
  0x12   :  { %1311 = vmatprep.subr.bf16.mxu1 %v1441_v17  ;;  %v1478_v4 = vld [vmem:[%s1917_s8 + $0x80] sm:$0xff]   ;;  %v1486_v8 = vld [vmem:[%s1917_s8 + $0x90] sm:$0xff]   ;;  %v1488_v9 = vld [vmem:[%s1917_s8 + $0xd8] sm:$0xff]  }
  0x13   :  { %v1490_v10 = vld [vmem:[%s1917_s8 + $0x98] sm:$0xff]   ;;  %v1492_v11 = vld [vmem:[%s1917_s8 + $0xe0] sm:$0xff]   ;;  %v1496_v13 = vld [vmem:[%s1917_s8 + $0xe8] sm:$0xff]  }
  0x14   :  { %1290 = vmatpush3.bf16.msra.mxu0 %v1442_v18  ;;  %v1494_v12 = vld [vmem:[%s1917_s8 + $0xa0] sm:$0xff]   ;;  %v1498_v14 = vld [vmem:[%s1917_s8 + $0xa8] sm:$0xff]   ;;  %v1500_v15 = vld [vmem:[%s1917_s8 + $0xf0] sm:$0xff]   ;;  %v528_v18 = vlaneseq }
  0x15   :  { %1312 = vmatpush3.bf16.msra.mxu1 %v1443_v19  ;;  %1291 = vmatprep.subr.bf16.mxu0 %v1444_v20  ;;  %v1502_v16 = vld [vmem:[%s1917_s8 + $0xb0] sm:$0xff]   ;;  %v1504_v17 = vld [vmem:[%s1917_s8 + $0xf8] sm:$0xff]   ;;  %v663_v20 = vld [vmem:[%s1918_s1] sm:$0xff] }
  0x16   :  { %1313 = vmatprep.subr.bf16.mxu1 %v1445_v21  ;;  %v1506_v19 = vld [vmem:[%s1917_s8 + $0xb8] sm:$0xff]   ;;  %v1795_v21 = vshrl.u32 %v528_v18, 7  ;;  %v1474_v37 = vld [vmem:[%s1915_s6 + $0x8] ss:$12 sps:$4 sm:$0xff]  }
  0x18   :  { %1292 = vmatpush3.bf16.msra.mxu0 %v1446_v22  ;;  %v1520_v22 = vmov 1983009808  }
  0x19   :  { %1314 = vmatpush3.bf16.msra.mxu1 %v1447_v23  ;;  %1293 = vmatprep.subr.bf16.mxu0 %v1448_v24  ;;  %v738_v23 = vunpack.c.l.s4 %v1520_v22  ;;  %v736_v24 = vcombine.high %v663_v20, %v663_v20  ;;  %v1240_v22 = vld [vmem:[%s1923_s9] ss:$0 sm:$0xff] }
  0x1a   :  { %1315 = vmatprep.subr.bf16.mxu1 %v1449_v25 }
  0x1b   :  { %v739_v25 = vunpack.c.0.s8 %v738_v23 }
  0x1c   :  { %1294 = vmatpush3.bf16.msra.mxu0 %v1450_v26 }
  0x1d   :  { %1316 = vmatpush3.bf16.msra.mxu1 %v1451_v27  ;;  %1295 = vmatprep.subr.bf16.mxu0 %v1452_v28  ;;  %v742_v26 = vsub.s32 %v739_v25, %v1795_v21 }
  0x1e   :  { %1317 = vmatprep.subr.bf16.mxu1 %v1453_v29 }
  0x1f   :  { %v750_v27 = vrot.slane %v736_v24, %v742_v26  ;;  %v743_v28 = vrot.slane %v663_v20, %v742_v26 }
  0x20   :  { %1296 = vmatpush3.bf16.msra.mxu0 %v1454_v30  ;;  %v1223_v30 = vld [vmem:[%s1919_s5] ss:$0 sm:$0xff] }
  0x21   :  { %1318 = vmatpush3.bf16.msra.mxu1 %v1455_v31  ;;  %1384 = vmatprep.subr.bf16.mxu0 %v1517_v39  ;;  %v752_v29 = vcombine.high %v750_v27, %v750_v27 }
  0x22   :  { %579 = vmatprep.subr.bf16.mxu1 %v1470_v48  ;;  %v1489_v48 = vld [vmem:[%s1917_s8 + $0x58] sm:$0xff]  }
  0x23   :  { %356 = vmatmul.mubr.bf16.vlgmr.msra.gmra.mrb[0].mxu0 %v1187_v34 }
  0x24   :  { %396 = vmatmul.mubr.bf16.vlgmr.msra.gmra.mrb[0].mxu1 %v1189_v36  ;;  %1385 = vmatpush3.bf16.msra.mxu0 %v1460_v38 }
  0x25   :  { %1386 = vmatprep.subr.bf16.mxu0 %v1517_v39  ;;  %1400 = vmatprep.mubr.msk.bf16.mxu0 %vm1518_vm0, %v1517_v39 }
  0x26   :  { %580 = vmatpush1.bf16.msra.mxu1 %v1468_v47  ;;  %611 = vmatprep.mubr.bf16.mxu1 %v1519_v2  ;;  %v1487_v47 = vld [vmem:[%s1917_s8 + $0x10] sm:$0xff]  }
  0x27   :  { %581 = vmatprep.subr.bf16.mxu1 %v1473_v0 }
  0x28   :  { %1387 = vmatpush3.bf16.msra.mxu0 %v1461_v40  ;;  %v1475_v40 = vld [vmem:[%s1915_s6 + $0x20] ss:$12 sps:$4 sm:$0xff]  }
  0x29   :  { %1388 = vmatprep.subr.bf16.mxu0 %v1517_v39 }
  0x2a   :  { %582 = vmatpush1.bf16.msra.mxu1 %v1471_v1 }
  0x2b   :  { %1404 = vmatprep.subr.bf16.mxu1 %v1517_v39 }
  0x2c   :  { %1389 = vmatpush3.bf16.msra.mxu0 %v1462_v41  ;;  %v1477_v41 = vld [vmem:[%s1917_s8 + $0x40] sm:$0xff]  }
  0x2d   :  { %1390 = vmatprep.subr.bf16.mxu0 %v1517_v39 }
  0x30   :  { %1391 = vmatpush3.bf16.msra.mxu0 %v1463_v42  ;;  %v1479_v42 = vld [vmem:[%s1917_s8] sm:$0xff]  }
  0x31   :  { %1392 = vmatprep.subr.bf16.mxu0 %v1517_v39 }
  0x34   :  { %1393 = vmatpush3.bf16.msra.mxu0 %v1464_v43  ;;  %v751_v43 = vcombine.high %v743_v28, %v743_v28 }
  0x35   :  { %1394 = vmatprep.subr.bf16.mxu0 %v1517_v39 }
  0x38   :  { %1395 = vmatpush3.bf16.msra.mxu0 %v1465_v44  ;;  %v1481_v44 = vld [vmem:[%s1917_s8 + $0x48] sm:$0xff]  }
  0x39   :  { %1396 = vmatprep.subr.bf16.mxu0 %v1517_v39 }
  0x3c   :  { %1397 = vmatpush3.bf16.msra.mxu0 %v1466_v45  ;;  %v1483_v45 = vld [vmem:[%s1917_s8 + $0x8] sm:$0xff]  }
  0x3d   :  { %1398 = vmatprep.subr.bf16.mxu0 %v1517_v39 }
  0x40   :  { %1399 = vmatpush3.bf16.msra.mxu0 %v1467_v46  ;;  %v1485_v46 = vld [vmem:[%s1917_s8 + $0x50] sm:$0xff]  }
  0x41   :  { %1359 = vmatprep.subr.bf16.mxu0 %v1476_v3  ;;  %v530_v3 = vsub.s32 0, %v1795_v21 }
  0xf6   :  { %v1297_v49 = vpop.f32.mrb[0].mxu0 }
  0xf7   :  { %v1319_v50 = vpop.f32.mrb[0].mxu1  ;;  %v1298_v52 = vpop.f32.mrb[1].mxu0 }
  0xf8   :  { %v1320_v53 = vpop.f32.mrb[1].mxu1  ;;  %v1299_v54 = vadd.f32 %v1298_v52, %v1297_v49  ;;  %v1300_v56 = vpop.f32.mrb[2].mxu0  ;;  %v1491_v49 = vld [vmem:[%s1917_s8 + $0x18] sm:$0xff]   ;;  %v1497_v52 = vld [vmem:[%s1917_s8 + $0x68] sm:$0xff]  }
  0xf9   :  { %v1321_v55 = vadd.f32 %v1320_v53, %v1319_v50  ;;  %v1322_v57 = vpop.f32.mrb[2].mxu1  ;;  %v1301_v58 = vpop.f32.mrb[3].mxu0  ;;  %v1493_v50 = vld [vmem:[%s1917_s8 + $0x60] sm:$0xff]   ;;  %v1499_v53 = vld [vmem:[%s1917_s8 + $0x28] sm:$0xff]   ;;  %v1505_v56 = vld [vmem:[%s1917_s8 + $0x78] sm:$0xff]  }
  0xfa   :  { %v1323_v59 = vpop.f32.mrb[3].mxu1  ;;  %v358_v60 = vadd.f32 %v1299_v54, %v1186_v51  ;;  %v1495_v51 = vld [vmem:[%s1917_s8 + $0x20] sm:$0xff]   ;;  %v1501_v54 = vld [vmem:[%s1917_s8 + $0x70] sm:$0xff]   ;;  %v1507_v57 = vld [vmem:[%s1917_s8 + $0x38] sm:$0xff]  }
  0xfb   :  { %v1511_v58 = vld [vmem:[%s1920_s10 + $0x4] ss:$12 sps:$4 sm:$0xff]   ;;  %v1509_v59 = vld [vmem:[%s1920_s10] ss:$12 sps:$4 sm:$0xff]  }
  0xfc   :  { %v398_v61 = vadd.f32 %v1321_v55, %v358_v60  ;;  %v1503_v55 = vld [vmem:[%s1917_s8 + $0x30] sm:$0xff]   ;;  %v1514_v60 = vld [vmem:[%s1920_s10 + $0x1c] ss:$12 sps:$4 sm:$0xff]  }
  0xfe   :  { %v403_v62 = vmax.f32 %v398_v61, 0.0  ;;  %v1512_v61 = vld [vmem:[%s1920_s10 + $0x18] ss:$12 sps:$4 sm:$0xff]  }
 0x100   :  { %v404_v63 = vpack.c.bf16 %v403_v62, %v403_v62 }
 0x102   :  { %1401 = vmatmul.mubr.bf16.vlgmr.msra.gmra.mrb[4].mxu0 %v404_v63 }
 0x103   :  { %1360 = vmatpush3.bf16.msra.mxu0 %v1478_v4  ;;  %1021 = vmatprep.mubr.bf16.mxu0 %v752_v29  ;;  %v526_v4 = vld [vmem:[%s1921_s7] sm:$0x7] }
 0x104   :  { %1361 = vmatprep.subr.bf16.mxu0 %v1480_v5  ;;  %v534_v5 = vsub.s32 1, %v1795_v21 }
 0x107   :  { %1362 = vmatpush3.bf16.msra.mxu0 %v1482_v6  ;;  %v531_v6 = vrot.slane %v526_v4, %v530_v3 }
 0x108   :  { %1363 = vmatprep.subr.bf16.mxu0 %v1484_v7  ;;  %v535_v7 = vrot.slane %v526_v4, %v534_v5 }
 0x10b   :  { %1364 = vmatpush3.bf16.msra.mxu0 %v1486_v8 }
 0x10c   :  { %1365 = vmatprep.subr.bf16.mxu0 %v1488_v9 }
 0x10f   :  { %1366 = vmatpush3.bf16.msra.mxu0 %v1490_v10 }
 0x110   :  { %1367 = vmatprep.subr.bf16.mxu0 %v1492_v11  ;;  %v538_v11 = vsub.s32 2, %v1795_v21 }
 0x113   :  { %1368 = vmatpush3.bf16.msra.mxu0 %v1494_v12 }
 0x114   :  { %1369 = vmatprep.subr.bf16.mxu0 %v1496_v13 }
 0x117   :  { %1370 = vmatpush3.bf16.msra.mxu0 %v1498_v14 }
 0x118   :  { %1371 = vmatprep.subr.bf16.mxu0 %v1500_v15  ;;  %v539_v15 = vrot.slane %v526_v4, %v538_v11 }
 0x11b   :  { %1372 = vmatpush3.bf16.msra.mxu0 %v1502_v16 }
 0x11c   :  { %1373 = vmatprep.subr.bf16.mxu0 %v1504_v17 }
 0x11f   :  { %1374 = vmatpush3.bf16.msra.mxu0 %v1506_v19 }
 0x122   :  { %1022 = vmatmul.mubr.bf16.vlgmr.msra.gmra.mrb[8].mxu0 %v750_v27 }
 0x1d5   :  { %v510_v31 = vpop.f32.mrb[4].mxu0 }
 0x1d6   :  { %v511_v32 = vadd.f32 %v1223_v30, %v510_v31  ;;  %v1402_v33 = vpop.f32.mrb[5].mxu0  ;;  %v1515_v30 = vld [vmem:[%s1920_s10 + $0x8] ss:$12 sps:$4 sm:$0xff]  }
 0x1d7   :  { %v513_v34 = vpop.f32.mrb[6].mxu0  ;;  %v1039_v33 = vld [vmem:[%s1924_s11] sm:$0x7] }
 0x1d8   :  { %v516_v35 = vmax.f32 %v511_v32, 0.0  ;;  %v1403_v36 = vpop.f32.mrb[7].mxu0  ;;  %v1516_v32 = vld [vmem:[%s1920_s10 + $0x20] ss:$12 sps:$4 sm:$0xff]   ;;  %v1044_v34 = vrot.slane %v1039_v33, %v530_v3 }
 0x1da   :  { %v517_v38 = vpack.c.bf16 %v516_v35, %v516_v35  ;;  %v1048_v35 = vrot.slane %v1039_v33, %v534_v5 }
 0x1dc   :  { %1238 = vmatmul.mubr.msk.bf16.vlgmr.msra.gmra.mrb[4].mxu1 %vm575_vm1, %v517_v38 }
 0x1dd   :  { %1405 = vmatpush3.bf16.msra.mxu1 %v1474_v37  ;;  %1408 = vmatprep.mubr.msk.bf16.mxu1 %vm1518_vm0, %v1517_v39 }
 0x1de   :  { %1406 = vmatprep.subr.bf16.mxu1 %v1517_v39 }
 0x1e1   :  { %1407 = vmatpush3.bf16.msra.mxu1 %v1475_v40 }
 0x1e2   :  { %1337 = vmatprep.subr.bf16.mxu1 %v1477_v41 }
 0x1e4   :  { %1409 = vmatmul.mubr.msk.bf16.vlgmr.msra.gmra.mrb[8].mxu1 %vm575_vm1, %v517_v38 }
 0x1e5   :  { %1338 = vmatpush3.bf16.msra.mxu1 %v1479_v42  ;;  %981 = vmatprep.mubr.bf16.mxu1 %v751_v43 }
 0x1e6   :  { %1339 = vmatprep.subr.bf16.mxu1 %v1481_v44  ;;  %v1052_v44 = vrot.slane %v1039_v33, %v538_v11 }
 0x1e9   :  { %1340 = vmatpush3.bf16.msra.mxu1 %v1483_v45 }
 0x1ea   :  { %1341 = vmatprep.subr.bf16.mxu1 %v1485_v46 }
 0x1ed   :  { %1342 = vmatpush3.bf16.msra.mxu1 %v1487_v47 }
 0x1ee   :  { %1343 = vmatprep.subr.bf16.mxu1 %v1489_v48 }
 0x1f1   :  { %1344 = vmatpush3.bf16.msra.mxu1 %v1491_v49 }
 0x1f2   :  { %1345 = vmatprep.subr.bf16.mxu1 %v1493_v50 }
 0x1f5   :  { %1346 = vmatpush3.bf16.msra.mxu1 %v1495_v51  ;;  %v1375_v62 = vpop.f32.mrb[8].mxu0 }
 0x1f6   :  { %1347 = vmatprep.subr.bf16.mxu1 %v1497_v52  ;;  %v1376_v63 = vpop.f32.mrb[9].mxu0 }
 0x1f7   :  { %v1377_v0 = vadd.f32 %v1376_v63, %v1375_v62  ;;  %v1378_v1 = vpop.f32.mrb[10].mxu0 }
 0x1f9   :  { %1348 = vmatpush3.bf16.msra.mxu1 %v1499_v53 }
 0x1fa   :  { %1349 = vmatprep.subr.bf16.mxu1 %v1501_v54 }
 0x1fd   :  { %1350 = vmatpush3.bf16.msra.mxu1 %v1503_v55 }
 0x1fe   :  { %1351 = vmatprep.subr.bf16.mxu1 %v1505_v56 }
 0x201   :  { %1352 = vmatpush3.bf16.msra.mxu1 %v1507_v57 }
 0x202   :  { %1091 = vmatprep.subr.bf16.mxu1 %v1511_v58 }
 0x204   :  { %982 = vmatmul.mubr.bf16.vlgmr.msra.gmra.mrb[12].mxu1 %v743_v28 }
 0x205   :  { %1123 = vmatprep.mubr.bf16.mxu1 %v1519_v2  ;;  %1092 = vmatpush1.bf16.msra.mxu1 %v1509_v59  ;;  %v1379_v2 = vpop.f32.mrb[11].mxu0 }
 0x206   :  { %1093 = vmatprep.subr.bf16.mxu1 %v1514_v60 }
 0x209   :  { %1094 = vmatpush1.bf16.msra.mxu1 %v1512_v61 }
 0x20a   :  { %1412 = vmatprep.subr.bf16.mxu1 %v1517_v39 }
 0x2af   :  { %v613_v8 = vpop.f32.mrb[4].mxu1 }
 0x2b0   :  { %v614_v9 = vadd.f32 %v613_v8, %v531_v6  ;;  %v615_v10 = vpop.f32.mrb[5].mxu1 }
 0x2b1   :  { %v616_v12 = vadd.f32 %v615_v10, %v535_v7  ;;  %v617_v13 = vpop.f32.mrb[6].mxu1 }
 0x2b2   :  { %660 = vst [vmem:[%s1922_s12] sm:$0xff] %v614_v9  ;;  %v618_v14 = vpop.f32.mrb[7].mxu1 }
 0x2b3   :  { %661 = vst [vmem:[%s1922_s12 + $0x8] sm:$0xff] %v616_v12 }
 0x2b7   :  { %v654_v16 = vpop.f32.mrb[8].mxu1 }
 0x2b8   :  { %v655_v17 = vadd.f32 %v654_v16, %v539_v15  ;;  %v1410_v18 = vpop.f32.mrb[9].mxu1 }
 0x2b9   :  { %v657_v19 = vpop.f32.mrb[10].mxu1 }
 0x2ba   :  { %662 = vst [vmem:[%s1922_s12 + $0x10] sm:$0xff] %v655_v17  ;;  %v1411_v20 = vpop.f32.mrb[11].mxu1 }
 0x2d7   :  { %v1353_v21 = vpop.f32.mrb[12].mxu1 }
 0x2d8   :  { %v1354_v23 = vpop.f32.mrb[13].mxu1 }
 0x2d9   :  { %v1355_v24 = vadd.f32 %v1354_v23, %v1353_v21  ;;  %v1356_v25 = vpop.f32.mrb[14].mxu1 }
 0x2da   :  { %v1357_v26 = vpop.f32.mrb[15].mxu1 }
 0x2db   :  { %v984_v27 = vadd.f32 %v1355_v24, %v1240_v22 }
 0x2dd   :  { %v1024_v28 = vadd.f32 %v1377_v0, %v984_v27 }
 0x2df   :  { %v1029_v29 = vmax.f32 %v1024_v28, 0.0 }
 0x2e1   :  { %v1030_v31 = vpack.c.bf16 %v1029_v29, %v1029_v29 }
 0x2e3   :  { %1279 = vmatmul.mubr.msk.bf16.vlgmr.msra.gmra.mrb[16].mxu1 %vm575_vm1, %v1030_v31 }
 0x2e4   :  { %1413 = vmatpush3.bf16.msra.mxu1 %v1515_v30  ;;  %1416 = vmatprep.mubr.msk.bf16.mxu1 %vm1518_vm0, %v1517_v39 }
 0x2e5   :  { %1414 = vmatprep.subr.bf16.mxu1 %v1517_v39 }
 0x2e8   :  { %1415 = vmatpush3.bf16.msra.mxu1 %v1516_v32 }
 0x2eb   :  { %1417 = vmatmul.mubr.msk.bf16.vlgmr.msra.gmra.mrb[20].mxu1 %vm575_vm1, %v1030_v31 }
 0x3b6   :  { %v1125_v36 = vpop.f32.mrb[16].mxu1 }
 0x3b7   :  { %v1126_v37 = vadd.f32 %v1125_v36, %v1044_v34  ;;  %v1127_v38 = vpop.f32.mrb[17].mxu1 }
 0x3b8   :  { %v1128_v40 = vadd.f32 %v1127_v38, %v1048_v35  ;;  %v1129_v41 = vpop.f32.mrb[18].mxu1 }
 0x3b9   :  { %v1130_v42 = vpop.f32.mrb[19].mxu1 }
 0x3ba   :  { %v1174_v43 = vcombine.low %v1126_v37, %v1128_v40 }
 0x3bc   :  { %1176 = vst [vmem:[%s1925_s13] sm:$0xff] %v1174_v43 }
 0x3be   :  { %v1166_v39 = vpop.f32.mrb[20].mxu1 }
 0x3bf   :  { %v1167_v45 = vadd.f32 %v1166_v39, %v1052_v44  ;;  %v1418_v46 = vpop.f32.mrb[21].mxu1 }
 0x3c0   :  { %v1169_v47 = vpop.f32.mrb[22].mxu1 }
 0x3c1   :  { %1177 = vst [vmem:[%s1925_s13 + $0x8] sm:$0xf] %v1167_v45  ;;  %v1419_v48 = vpop.f32.mrb[23].mxu1 }

</bundles_post_ra>
